<compile_context>
chip_gen: v6e
topology: v6e:2x2x1
jax: 0.10.0
libtpu: 0.0.40
codegen_flags: <defaults>
</compile_context>

<pallas_src>
import jax
import jax.numpy as jnp
from jax import lax
from jax.experimental import pallas as pl
from jax.experimental.pallas import tpu as pltpu


# ----------------------------------------------------------------------------
# Pallas kernel: run ALL NCA steps for one batch element (steps loop in-kernel).
# ----------------------------------------------------------------------------
def backbone_kernel(x_ref, masks_ref, w9_ref, bias_ref, fc1_ref, out_ref):
    x0 = x_ref[0]                           # (W, H, C) float32, initial state
    W, H, C = x0.shape
    WH = W * H
    steps = masks_ref.shape[0]

    def step_fn(s, x):
        # Reflect padding along W (exclude-edge, matches padding_mode="reflect"),
        # cheap leading-dim concat.
        xpW = jnp.concatenate([x[1:2], x, x[W - 2:W - 1]], axis=0)        # (W+2, H, C)
        # H-shifted variants (tap dh reads column h + dh - 1, reflect at edges).
        xh0 = jnp.concatenate([xpW[:, 1:2], xpW[:, :H - 1]], axis=1)      # h-1
        xh2 = jnp.concatenate([xpW[:, 1:], xpW[:, H - 2:H - 1]], axis=1)  # h+1
        shifted = (xh0, xpW, xh2)

        # Fused conv0/conv1/fc0: 9 shifted matmuls against folded (C, hidden)
        # weights.  w9_ref[dh*3+dw] already contains
        #   p0w[:, :, dh, dw].T @ fc0w[C:2C] + p1w[:, :, dh, dw].T @ fc0w[2C:3C]
        # (+ the identity x-term folded into the center tap dh=dw=1).
        hid = jnp.zeros((WH, bias_ref.shape[1]), jnp.float32)
        for dh in range(3):
            xh = shifted[dh]
            for dw in range(3):
                xs = xh[dw:dw + W].reshape(WH, C)                         # x[w+dw-1, h+dh-1]
                hid = hid + jnp.dot(xs, w9_ref[dh * 3 + dw],
                                    preferred_element_type=jnp.float32)
        hid = jnp.maximum(hid + bias_ref[...], 0.0)                       # pre-folded bias + ReLU
        dx = jnp.dot(hid, fc1_ref[...],
                     preferred_element_type=jnp.float32)                  # (W*H, C)

        # Stochastic fire-rate mask (per cell, broadcast over channels) + residual.
        # fc1 columns for the fixed input channels are zeroed offline, so the
        # residual never touches them (== torch's channel concat in forward()).
        mask = masks_ref[s][0]                                            # (W, H)
        return x + dx.reshape(W, H, C) * mask[:, :, None]

    out_ref[...] = lax.fori_loop(0, steps, step_fn, x0)[None]


# ----------------------------------------------------------------------------
# Offline weight folding: conv -> fc0 fusion, bias fusion, fixed-channel mask.
# ----------------------------------------------------------------------------
def fold_backbone_params(params, input_channels):
    C = params["p0_b"].shape[1]
    fc0_w = params["fc0_w"]                      # (3C, hidden)
    fc0_x, fc0_y1, fc0_y2 = fc0_w[:C], fc0_w[C:2 * C], fc0_w[2 * C:3 * C]

    # w9[k] = p0_w9[k] @ fc0_y1 + p1_w9[k] @ fc0_y2   (C_in, hidden)
    w9 = (jnp.einsum("kio,oh->kih", params["p0_w9"], fc0_y1)
          + jnp.einsum("kio,oh->kih", params["p1_w9"], fc0_y2))
    w9 = w9.at[4].add(fc0_x)                     # identity (x) term on center tap

    bias = (params["p0_b"] @ fc0_y1 + params["p1_b"] @ fc0_y2
            + params["fc0_b"])                   # (1, hidden)

    # Zero fc1 output columns for channels < input_channels: residual leaves the
    # input channels untouched, equivalent to the torch channel concat.
    chan_mask = (jnp.arange(C) >= input_channels).astype(jnp.float32)
    fc1 = params["fc1_w"] * chan_mask[None, :]   # (hidden, C)
    return (w9.astype(jnp.float32), bias.astype(jnp.float32),
            fc1.astype(jnp.float32))


# ----------------------------------------------------------------------------
# Wrapper: run one BackboneNCA for `steps` steps, grid=(batch,), steps in-kernel.
# ----------------------------------------------------------------------------
def run_backbone(x, masks, params, input_channels):
    N, W, H, C = x.shape
    steps = masks.shape[0]
    w9, bias, fc1 = fold_backbone_params(params, input_channels)
    hidden = bias.shape[1]

    flops = 2 * steps * N * W * H * (9 * C * hidden + hidden * C)
    bytes_accessed = 4 * (2 * x.size + masks.size + w9.size + bias.size + fc1.size)

    return pl.pallas_call(
        backbone_kernel,
        out_shape=jax.ShapeDtypeStruct((N, W, H, C), jnp.float32),
        grid_spec=pltpu.PrefetchScalarGridSpec(
            num_scalar_prefetch=0,
            grid=(N,),
            in_specs=[
                pl.BlockSpec((1, W, H, C), lambda n: (n, 0, 0, 0)),      # initial state
                pl.BlockSpec((steps, 1, W, H), lambda n: (0, n, 0, 0)),  # fire masks (all steps)
                pl.BlockSpec((9, C, hidden), lambda n: (0, 0, 0)),       # folded conv+fc0 weights
                pl.BlockSpec((1, hidden), lambda n: (0, 0)),             # folded bias
                pl.BlockSpec((hidden, C), lambda n: (0, 0)),             # fc1 (masked cols)
            ],
            out_specs=pl.BlockSpec((1, W, H, C), lambda n: (n, 0, 0, 0)),
        ),
        compiler_params=pltpu.CompilerParams(dimension_semantics=("parallel",)),
        cost_estimate=pl.CostEstimate(flops=flops, transcendentals=0,
                                      bytes_accessed=bytes_accessed),
    )(x.astype(jnp.float32), masks.astype(jnp.float32), w9, bias, fc1)


# ----------------------------------------------------------------------------
# MedNCA forward (eval path: forward_eval), glue in plain JAX.
# ----------------------------------------------------------------------------
def med_nca_forward(x_nchw, y_nchw, params_low, params_high, masks_low,
                    masks_high, channel_n, input_channels, output_channels):
    N, cin, Hh, Ww = x_nchw.shape

    # make_seed: zeros (N, channel_n, H, W), first input channels copied from x.
    seed = jnp.zeros((N, channel_n, Hh, Ww), jnp.float32)
    seed = seed.at[:, :cin].set(x_nchw)

    # x.transpose(1, 3): NCHW -> (N, W, H, C)
    x = jnp.transpose(seed, (0, 3, 2, 1))
    y = jnp.transpose(y_nchw, (0, 3, 2, 1))

    Wd, Hd = Ww // 4, Hh // 4
    # TODO(synk): torchio Resize uses ITK (B-spline/linear) interpolation; approximated
    # here with jax.image.resize(method="linear") on the spatial dims.
    inputs_loc = jax.image.resize(x, (N, Wd, Hd, channel_n), method="linear")

    # Low-res NCA (Pallas kernel).
    out_low = run_backbone(inputs_loc, masks_low, params_low, input_channels)

    # nn.Upsample(scale_factor=4, mode='nearest') == integer repeat on spatial dims.
    up = jnp.repeat(jnp.repeat(out_low, 4, axis=1), 4, axis=2)           # (N, W, H, C)

    # Replace hidden channels of the full-res seed with the upsampled low-res state.
    inputs_hi = jnp.concatenate(
        [x[..., :input_channels], up[..., input_channels:]], axis=3)

    # High-res NCA (Pallas kernel).
    out_hi = run_backbone(inputs_hi, masks_high, params_high, input_channels)

    return out_hi[..., input_channels:input_channels + output_channels], y


# ----------------------------------------------------------------------------
# Deterministic synthetic parameters (BackboneNCA shapes).
# ----------------------------------------------------------------------------
def init_backbone_params(key, channel_n, hidden):
    C = channel_n
    ks = jax.random.split(key, 7)
    p0_w = jax.random.normal(ks[0], (C, C, 3, 3), jnp.float32) * 0.1
    p0_b = jax.random.normal(ks[1], (1, C), jnp.float32) * 0.01
    p1_w = jax.random.normal(ks[2], (C, C, 3, 3), jnp.float32) * 0.1
    p1_b = jax.random.normal(ks[3], (1, C), jnp.float32) * 0.01
    fc0_w = jax.random.normal(ks[4], (3 * C, hidden), jnp.float32) / jnp.sqrt(3.0 * C)
    fc0_b = jax.random.normal(ks[5], (1, hidden), jnp.float32) * 0.01
    fc1_w = jax.random.normal(ks[6], (hidden, C), jnp.float32) / jnp.sqrt(1.0 * hidden)

    # Flatten conv weights to (9, C_in, C_out): entry[dh*3+dw] = w[:, :, dh, dw].T
    def flat(w):
        return jnp.stack([w[:, :, dh, dw].T for dh in range(3) for dw in range(3)],
                         axis=0)

    return dict(p0_w9=flat(p0_w), p0_b=p0_b, p1_w9=flat(p1_w), p1_b=p1_b,
                fc0_w=fc0_w, fc0_b=fc0_b, fc1_w=fc1_w)


if __name__ == "__main__":
    key = jax.random.PRNGKey(0)
    channel_n = 16
    hidden_size = 64
    steps = 4
    fire_rate = 0.5
    input_channels = 1
    output_channels = 1
    N, Hh, Ww = 2, 32, 32

    k = jax.random.split(key, 6)
    x = jax.random.uniform(k[0], (N, input_channels, Hh, Ww), jnp.float32)
    y = jax.random.uniform(k[1], (N, output_channels, Hh, Ww), jnp.float32)

    params_low = init_backbone_params(k[2], channel_n, hidden_size)
    params_high = init_backbone_params(k[3], channel_n, hidden_size)

    # Fire masks: (rand > fire_rate).float(), one per step / batch / cell.
    masks_low = (jax.random.uniform(k[4], (steps, N, Ww // 4, Hh // 4))
                 > fire_rate).astype(jnp.float32)
    masks_high = (jax.random.uniform(k[5], (steps, N, Ww, Hh))
                  > fire_rate).astype(jnp.float32)

    out, y_t = med_nca_forward(x, y, params_low, params_high, masks_low,
                               masks_high, channel_n, input_channels,
                               output_channels)
    out = jax.block_until_ready(out)
    y_t = jax.block_until_ready(y_t)

    assert out.shape == (N, Ww, Hh, output_channels), out.shape
    assert y_t.shape == (N, Ww, Hh, output_channels), y_t.shape
    assert bool(jnp.all(jnp.isfinite(out)))
    print("KERNEL_OK")
</pallas_src>

<mosaic_0001>
module attributes {stable_mosaic.version = 11 : i64} {
  func.func @backbone_kernel(%arg0: i32, %arg1: memref<1x8x8x16xf32, #tpu.memory_space<vmem>>, %arg2: memref<4x1x8x8xf32, #tpu.memory_space<vmem>>, %arg3: memref<9x16x64xf32, #tpu.memory_space<vmem>>, %arg4: memref<1x64xf32, #tpu.memory_space<vmem>>, %arg5: memref<64x16xf32, #tpu.memory_space<vmem>>, %arg6: memref<1x8x8x16xf32, #tpu.memory_space<vmem>>) attributes {dimension_semantics = [#tpu.dimension_semantics<parallel>], iteration_bounds = array<i64: 2>, scalar_prefetch = 0 : i64, scratch_operands = 0 : i64, tpu.core_type = #tpu.core_type<tc>, window_params = [{transform_indices = @transform_0, window_bounds = array<i64: 1, 8, 8, 16>}, {transform_indices = @transform_1, window_bounds = array<i64: 4, 1, 8, 8>}, {pipeline_mode = #tpu.pipeline_mode<synchronous>, transform_indices = @transform_2, window_bounds = array<i64: 9, 16, 64>}, {pipeline_mode = #tpu.pipeline_mode<synchronous>, transform_indices = @transform_3, window_bounds = array<i64: 1, 64>}, {pipeline_mode = #tpu.pipeline_mode<synchronous>, transform_indices = @transform_4, window_bounds = array<i64: 64, 16>}, {transform_indices = @transform_5, window_bounds = array<i64: 1, 8, 8, 16>}]} {
    %c0 = arith.constant 0 : index
    %c0_0 = arith.constant 0 : index
    %c0_1 = arith.constant 0 : index
    %c0_2 = arith.constant 0 : index
    %0 = vector.load %arg1[%c0, %c0_0, %c0_1, %c0_2] : memref<1x8x8x16xf32, #tpu.memory_space<vmem>>, vector<1x8x8x16xf32>
    %1 = vector.shape_cast %0 : vector<1x8x8x16xf32> to vector<8x8x16xf32>
    %c0_i32 = arith.constant 0 : i32
    %c4_i32 = arith.constant 4 : i32
    %2 = arith.addi %c0_i32, %c4_i32 : i32
    %c1_i32 = arith.constant 1 : i32
    %3 = scf.for %arg7 = %c0_i32 to %2 step %c1_i32 iter_args(%arg8 = %1) -> (vector<8x8x16xf32>)  : i32 {
      %6 = vector.extract_strided_slice %arg8 {offsets = [1, 0, 0], sizes = [1, 8, 16], strides = [1, 1, 1]} : vector<8x8x16xf32> to vector<1x8x16xf32>
      %7 = vector.extract_strided_slice %arg8 {offsets = [6, 0, 0], sizes = [1, 8, 16], strides = [1, 1, 1]} : vector<8x8x16xf32> to vector<1x8x16xf32>
      %8 = tpu.concatenate %6, %arg8, %7 in 0 : vector<1x8x16xf32>, vector<8x8x16xf32>, vector<1x8x16xf32> -> vector<10x8x16xf32>
      %9 = vector.extract_strided_slice %8 {offsets = [0, 1, 0], sizes = [10, 1, 16], strides = [1, 1, 1]} : vector<10x8x16xf32> to vector<10x1x16xf32>
      %10 = vector.extract_strided_slice %8 {offsets = [0, 0, 0], sizes = [10, 7, 16], strides = [1, 1, 1]} : vector<10x8x16xf32> to vector<10x7x16xf32>
      %11 = tpu.concatenate %9, %10 in 1 : vector<10x1x16xf32>, vector<10x7x16xf32> -> vector<10x8x16xf32>
      %12 = vector.extract_strided_slice %8 {offsets = [0, 1, 0], sizes = [10, 7, 16], strides = [1, 1, 1]} : vector<10x8x16xf32> to vector<10x7x16xf32>
      %13 = vector.extract_strided_slice %8 {offsets = [0, 6, 0], sizes = [10, 1, 16], strides = [1, 1, 1]} : vector<10x8x16xf32> to vector<10x1x16xf32>
      %14 = tpu.concatenate %12, %13 in 1 : vector<10x7x16xf32>, vector<10x1x16xf32> -> vector<10x8x16xf32>
      %cst = arith.constant 0.000000e+00 : f32
      %15 = vector.broadcast %cst : f32 to vector<64x64xf32>
      %16 = vector.extract_strided_slice %11 {offsets = [0, 0, 0], sizes = [8, 8, 16], strides = [1, 1, 1]} : vector<10x8x16xf32> to vector<8x8x16xf32>
      %17 = vector.shape_cast %16 : vector<8x8x16xf32> to vector<64x16xf32>
      %c0_8 = arith.constant 0 : index
      %c0_9 = arith.constant 0 : index
      %c0_10 = arith.constant 0 : index
      %18 = vector.load %arg3[%c0_8, %c0_9, %c0_10] : memref<9x16x64xf32, #tpu.memory_space<vmem>>, vector<1x16x64xf32>
      %19 = vector.shape_cast %18 : vector<1x16x64xf32> to vector<16x64xf32>
      %cst_11 = arith.constant dense<0.000000e+00> : vector<64x64xf32>
      %20 = tpu.matmul %17, %19, %cst_11 {dimension_numbers = #tpu.dot_dimension_numbers<[1], [0], [0], [1], [0, 0, 1, 1], [], []>} : vector<64x16xf32>, vector<16x64xf32>, vector<64x64xf32> -> vector<64x64xf32>
      %21 = arith.addf %15, %20 : vector<64x64xf32>
      %22 = vector.extract_strided_slice %11 {offsets = [1, 0, 0], sizes = [8, 8, 16], strides = [1, 1, 1]} : vector<10x8x16xf32> to vector<8x8x16xf32>
      %23 = vector.shape_cast %22 : vector<8x8x16xf32> to vector<64x16xf32>
      %c1 = arith.constant 1 : index
      %c0_12 = arith.constant 0 : index
      %c0_13 = arith.constant 0 : index
      %24 = vector.load %arg3[%c1, %c0_12, %c0_13] : memref<9x16x64xf32, #tpu.memory_space<vmem>>, vector<1x16x64xf32>
      %25 = vector.shape_cast %24 : vector<1x16x64xf32> to vector<16x64xf32>
      %cst_14 = arith.constant dense<0.000000e+00> : vector<64x64xf32>
      %26 = tpu.matmul %23, %25, %cst_14 {dimension_numbers = #tpu.dot_dimension_numbers<[1], [0], [0], [1], [0, 0, 1, 1], [], []>} : vector<64x16xf32>, vector<16x64xf32>, vector<64x64xf32> -> vector<64x64xf32>
      %27 = arith.addf %21, %26 : vector<64x64xf32>
      %28 = vector.extract_strided_slice %11 {offsets = [2, 0, 0], sizes = [8, 8, 16], strides = [1, 1, 1]} : vector<10x8x16xf32> to vector<8x8x16xf32>
      %29 = vector.shape_cast %28 : vector<8x8x16xf32> to vector<64x16xf32>
      %c2 = arith.constant 2 : index
      %c0_15 = arith.constant 0 : index
      %c0_16 = arith.constant 0 : index
      %30 = vector.load %arg3[%c2, %c0_15, %c0_16] : memref<9x16x64xf32, #tpu.memory_space<vmem>>, vector<1x16x64xf32>
      %31 = vector.shape_cast %30 : vector<1x16x64xf32> to vector<16x64xf32>
      %cst_17 = arith.constant dense<0.000000e+00> : vector<64x64xf32>
      %32 = tpu.matmul %29, %31, %cst_17 {dimension_numbers = #tpu.dot_dimension_numbers<[1], [0], [0], [1], [0, 0, 1, 1], [], []>} : vector<64x16xf32>, vector<16x64xf32>, vector<64x64xf32> -> vector<64x64xf32>
      %33 = arith.addf %27, %32 : vector<64x64xf32>
      %34 = vector.extract_strided_slice %8 {offsets = [0, 0, 0], sizes = [8, 8, 16], strides = [1, 1, 1]} : vector<10x8x16xf32> to vector<8x8x16xf32>
      %35 = vector.shape_cast %34 : vector<8x8x16xf32> to vector<64x16xf32>
      %c3 = arith.constant 3 : index
      %c0_18 = arith.constant 0 : index
      %c0_19 = arith.constant 0 : index
      %36 = vector.load %arg3[%c3, %c0_18, %c0_19] : memref<9x16x64xf32, #tpu.memory_space<vmem>>, vector<1x16x64xf32>
      %37 = vector.shape_cast %36 : vector<1x16x64xf32> to vector<16x64xf32>
      %cst_20 = arith.constant dense<0.000000e+00> : vector<64x64xf32>
      %38 = tpu.matmul %35, %37, %cst_20 {dimension_numbers = #tpu.dot_dimension_numbers<[1], [0], [0], [1], [0, 0, 1, 1], [], []>} : vector<64x16xf32>, vector<16x64xf32>, vector<64x64xf32> -> vector<64x64xf32>
      %39 = arith.addf %33, %38 : vector<64x64xf32>
      %40 = vector.extract_strided_slice %8 {offsets = [1, 0, 0], sizes = [8, 8, 16], strides = [1, 1, 1]} : vector<10x8x16xf32> to vector<8x8x16xf32>
      %41 = vector.shape_cast %40 : vector<8x8x16xf32> to vector<64x16xf32>
      %c4 = arith.constant 4 : index
      %c0_21 = arith.constant 0 : index
      %c0_22 = arith.constant 0 : index
      %42 = vector.load %arg3[%c4, %c0_21, %c0_22] : memref<9x16x64xf32, #tpu.memory_space<vmem>>, vector<1x16x64xf32>
      %43 = vector.shape_cast %42 : vector<1x16x64xf32> to vector<16x64xf32>
      %cst_23 = arith.constant dense<0.000000e+00> : vector<64x64xf32>
      %44 = tpu.matmul %41, %43, %cst_23 {dimension_numbers = #tpu.dot_dimension_numbers<[1], [0], [0], [1], [0, 0, 1, 1], [], []>} : vector<64x16xf32>, vector<16x64xf32>, vector<64x64xf32> -> vector<64x64xf32>
      %45 = arith.addf %39, %44 : vector<64x64xf32>
      %46 = vector.extract_strided_slice %8 {offsets = [2, 0, 0], sizes = [8, 8, 16], strides = [1, 1, 1]} : vector<10x8x16xf32> to vector<8x8x16xf32>
      %47 = vector.shape_cast %46 : vector<8x8x16xf32> to vector<64x16xf32>
      %c5 = arith.constant 5 : index
      %c0_24 = arith.constant 0 : index
      %c0_25 = arith.constant 0 : index
      %48 = vector.load %arg3[%c5, %c0_24, %c0_25] : memref<9x16x64xf32, #tpu.memory_space<vmem>>, vector<1x16x64xf32>
      %49 = vector.shape_cast %48 : vector<1x16x64xf32> to vector<16x64xf32>
      %cst_26 = arith.constant dense<0.000000e+00> : vector<64x64xf32>
      %50 = tpu.matmul %47, %49, %cst_26 {dimension_numbers = #tpu.dot_dimension_numbers<[1], [0], [0], [1], [0, 0, 1, 1], [], []>} : vector<64x16xf32>, vector<16x64xf32>, vector<64x64xf32> -> vector<64x64xf32>
      %51 = arith.addf %45, %50 : vector<64x64xf32>
      %52 = vector.extract_strided_slice %14 {offsets = [0, 0, 0], sizes = [8, 8, 16], strides = [1, 1, 1]} : vector<10x8x16xf32> to vector<8x8x16xf32>
      %53 = vector.shape_cast %52 : vector<8x8x16xf32> to vector<64x16xf32>
      %c6 = arith.constant 6 : index
      %c0_27 = arith.constant 0 : index
      %c0_28 = arith.constant 0 : index
      %54 = vector.load %arg3[%c6, %c0_27, %c0_28] : memref<9x16x64xf32, #tpu.memory_space<vmem>>, vector<1x16x64xf32>
      %55 = vector.shape_cast %54 : vector<1x16x64xf32> to vector<16x64xf32>
      %cst_29 = arith.constant dense<0.000000e+00> : vector<64x64xf32>
      %56 = tpu.matmul %53, %55, %cst_29 {dimension_numbers = #tpu.dot_dimension_numbers<[1], [0], [0], [1], [0, 0, 1, 1], [], []>} : vector<64x16xf32>, vector<16x64xf32>, vector<64x64xf32> -> vector<64x64xf32>
      %57 = arith.addf %51, %56 : vector<64x64xf32>
      %58 = vector.extract_strided_slice %14 {offsets = [1, 0, 0], sizes = [8, 8, 16], strides = [1, 1, 1]} : vector<10x8x16xf32> to vector<8x8x16xf32>
      %59 = vector.shape_cast %58 : vector<8x8x16xf32> to vector<64x16xf32>
      %c7 = arith.constant 7 : index
      %c0_30 = arith.constant 0 : index
      %c0_31 = arith.constant 0 : index
      %60 = vector.load %arg3[%c7, %c0_30, %c0_31] : memref<9x16x64xf32, #tpu.memory_space<vmem>>, vector<1x16x64xf32>
      %61 = vector.shape_cast %60 : vector<1x16x64xf32> to vector<16x64xf32>
      %cst_32 = arith.constant dense<0.000000e+00> : vector<64x64xf32>
      %62 = tpu.matmul %59, %61, %cst_32 {dimension_numbers = #tpu.dot_dimension_numbers<[1], [0], [0], [1], [0, 0, 1, 1], [], []>} : vector<64x16xf32>, vector<16x64xf32>, vector<64x64xf32> -> vector<64x64xf32>
      %63 = arith.addf %57, %62 : vector<64x64xf32>
      %64 = vector.extract_strided_slice %14 {offsets = [2, 0, 0], sizes = [8, 8, 16], strides = [1, 1, 1]} : vector<10x8x16xf32> to vector<8x8x16xf32>
      %65 = vector.shape_cast %64 : vector<8x8x16xf32> to vector<64x16xf32>
      %c8 = arith.constant 8 : index
      %c0_33 = arith.constant 0 : index
      %c0_34 = arith.constant 0 : index
      %66 = vector.load %arg3[%c8, %c0_33, %c0_34] : memref<9x16x64xf32, #tpu.memory_space<vmem>>, vector<1x16x64xf32>
      %67 = vector.shape_cast %66 : vector<1x16x64xf32> to vector<16x64xf32>
      %cst_35 = arith.constant dense<0.000000e+00> : vector<64x64xf32>
      %68 = tpu.matmul %65, %67, %cst_35 {dimension_numbers = #tpu.dot_dimension_numbers<[1], [0], [0], [1], [0, 0, 1, 1], [], []>} : vector<64x16xf32>, vector<16x64xf32>, vector<64x64xf32> -> vector<64x64xf32>
      %69 = arith.addf %63, %68 : vector<64x64xf32>
      %c0_36 = arith.constant 0 : index
      %c0_37 = arith.constant 0 : index
      %70 = vector.load %arg4[%c0_36, %c0_37] : memref<1x64xf32, #tpu.memory_space<vmem>>, vector<1x64xf32>
      %71 = vector.broadcast %70 : vector<1x64xf32> to vector<64x64xf32>
      %72 = arith.addf %69, %71 : vector<64x64xf32>
      %cst_38 = arith.constant 0.000000e+00 : f32
      %73 = vector.broadcast %cst_38 : f32 to vector<64x64xf32>
      %74 = arith.maximumf %72, %73 : vector<64x64xf32>
      %c0_39 = arith.constant 0 : index
      %c0_40 = arith.constant 0 : index
      %75 = vector.load %arg5[%c0_39, %c0_40] : memref<64x16xf32, #tpu.memory_space<vmem>>, vector<64x16xf32>
      %cst_41 = arith.constant dense<0.000000e+00> : vector<64x16xf32>
      %76 = tpu.matmul %74, %75, %cst_41 {dimension_numbers = #tpu.dot_dimension_numbers<[1], [0], [0], [1], [0, 0, 1, 1], [], []>} : vector<64x64xf32>, vector<64x16xf32>, vector<64x16xf32> -> vector<64x16xf32>
      %77 = arith.index_cast %arg7 : i32 to index
      %c0_42 = arith.constant 0 : index
      %c0_43 = arith.constant 0 : index
      %c0_44 = arith.constant 0 : index
      %78 = vector.load %arg2[%77, %c0_42, %c0_43, %c0_44] : memref<4x1x8x8xf32, #tpu.memory_space<vmem>>, vector<1x1x8x8xf32>
      %79 = vector.shape_cast %78 : vector<1x1x8x8xf32> to vector<1x8x8xf32>
      %80 = vector.shape_cast %79 : vector<1x8x8xf32> to vector<8x8xf32>
      %81 = vector.shape_cast %76 : vector<64x16xf32> to vector<8x8x16xf32>
      %82 = vector.shape_cast %80 : vector<8x8xf32> to vector<8x8x1xf32>
      %83 = vector.broadcast %82 : vector<8x8x1xf32> to vector<8x8x16xf32>
      %84 = arith.mulf %81, %83 : vector<8x8x16xf32>
      %85 = arith.addf %arg8, %84 : vector<8x8x16xf32>
      scf.yield %85 : vector<8x8x16xf32>
    }
    %c4_i32_3 = arith.constant 4 : i32
    %4 = vector.shape_cast %3 : vector<8x8x16xf32> to vector<1x8x8x16xf32>
    %c0_4 = arith.constant 0 : index
    %c0_5 = arith.constant 0 : index
    %c0_6 = arith.constant 0 : index
    %c0_7 = arith.constant 0 : index
    %5 = vector.load %arg6[%c0_4, %c0_5, %c0_6, %c0_7] : memref<1x8x8x16xf32, #tpu.memory_space<vmem>>, vector<1x8x8x16xf32>
    tpu.vector_store %arg6[%c0_4, %c0_5, %c0_6, %c0_7], %4 {strides = array<i32>} : memref<1x8x8x16xf32, #tpu.memory_space<vmem>>, vector<1x8x8x16xf32>,
    return
  }
  func.func @transform_0(%arg0: i32) -> (i32, i32, i32, i32) {
    %c0_i32 = arith.constant 0 : i32
    %c0_i32_0 = arith.constant 0 : i32
    %c0_i32_1 = arith.constant 0 : i32
    %c0_i32_2 = arith.constant 0 : i32
    return %arg0, %c0_i32, %c0_i32_0, %c0_i32_1 : i32, i32, i32, i32
  }
  func.func @transform_1(%arg0: i32) -> (i32, i32, i32, i32) {
    %c0_i32 = arith.constant 0 : i32
    %c0_i32_0 = arith.constant 0 : i32
    %c0_i32_1 = arith.constant 0 : i32
    %c0_i32_2 = arith.constant 0 : i32
    return %c0_i32, %arg0, %c0_i32_0, %c0_i32_1 : i32, i32, i32, i32
  }
  func.func @transform_2(%arg0: i32) -> (i32, i32, i32) {
    %c0_i32 = arith.constant 0 : i32
    %c0_i32_0 = arith.constant 0 : i32
    %c0_i32_1 = arith.constant 0 : i32
    %c0_i32_2 = arith.constant 0 : i32
    return %c0_i32, %c0_i32_0, %c0_i32_1 : i32, i32, i32
  }
  func.func @transform_3(%arg0: i32) -> (i32, i32) {
    %c0_i32 = arith.constant 0 : i32
    %c0_i32_0 = arith.constant 0 : i32
    %c0_i32_1 = arith.constant 0 : i32
    return %c0_i32, %c0_i32_0 : i32, i32
  }
  func.func @transform_4(%arg0: i32) -> (i32, i32) {
    %c0_i32 = arith.constant 0 : i32
    %c0_i32_0 = arith.constant 0 : i32
    %c0_i32_1 = arith.constant 0 : i32
    return %c0_i32, %c0_i32_0 : i32, i32
  }
  func.func @transform_5(%arg0: i32) -> (i32, i32, i32, i32) {
    %c0_i32 = arith.constant 0 : i32
    %c0_i32_0 = arith.constant 0 : i32
    %c0_i32_1 = arith.constant 0 : i32
    %c0_i32_2 = arith.constant 0 : i32
    return %arg0, %c0_i32, %c0_i32_0, %c0_i32_1 : i32, i32, i32, i32
  }
}

</mosaic_0001>

<bundles_post_ra>
// kernel: tpu_custom_call.1
= control target key start
LH: loop header
LB: loop body
LE: loop exit
PB: predicated region body
PF: predicated region fallthrough
CT: control target
= control target key end

     0   :  { %10 = vsyncpa [#allocation3], 0  ;;  %s3150_s0 = inlined_call_operand.hbm [shape: f32[2,8,8,16], index: 0, kind: input, shape index: {}]   ;;  %s3151_s1 = inlined_call_operand.vmem [shape: f32[4,2,8,8], index: 1, kind: input, shape index: {}]   ;;  %s3152_s2 = inlined_call_operand.hbm [shape: f32[9,16,64], index: 2, kind: input, shape index: {}]   ;;  %s3153_s3 = inlined_call_operand.vmem [shape: f32[1,64], index: 3, kind: input, shape index: {}]   ;;  %s3154_s4 = inlined_call_operand.vmem [shape: f32[64,16], index: 4, kind: input, shape index: {}]   ;;  %s3155_s5 = inlined_call_operand.hbm [shape: f32[2,8,8,16], index: 5, kind: output, shape index: {}]  }
   0x1   :  { %12 = vsyncpa [#allocation3 + $0x1], 0 }
   0x2   :  { %13 = vsyncpa [#allocation7], 0 }
   0x3   :  { %14 = vsyncpa [#allocation4], 0 }
   0x4   :  { %16 = vsyncpa [#allocation4 + $0x1], 0  ;;  %s2632_s18 = smov 0   ;;  %s2634_s19 = smov 0  }
   0x5   :  { %s2636_s20 = smov 0   ;;  %s2638_s21 = smov 0  }
   0x6 LB: > { %s2653_s22 = sadd.s32 4294967295, %s2555_s21   ;;  %s1888_s23 = sadd.s32 4294967294, %s2555_s21   ;;  %s2555_s21 = sphi %s2638_s21, %s3210_s21   ;;  %s2551_s20 = sphi %s2636_s20, %s3209_s20   ;;  %s2547_s19 = sphi %s2634_s19, %s3208_s19   ;;  %s2543_s18 = sphi %s2632_s18, %s3207_s18  }
   0x7   : > { %s2657_s24 = sadd.s32 1, %s2555_s21   ;;  %s29_s25 = sadd.s32 1, %s2551_s20 }
   0x8   : > { %s26_s26 = ssub.s32 %s2555_s21, %s2657_s24  ;;  %p36_p0 = scmp.ne.s32.totalorder %s2551_s20, %s2547_s19 }
   0x9   : > { %p27_p1 = scmp.eq.s32.totalorder %s26_s26, 0  ;;  %p37_p2 = scmp.eq.s32.totalorder %s2555_s21, 0 }
   0xa   : > { %p42_p3 = scmp.ne.s32.totalorder %s2547_s19, %s2543_s18  ;;  %p3159_p4 = scmp.eq.s32.totalorder %s2653_s22, 0 }
   0xb   : > { %s2669_s27 = scalar_select %p27_p1, %s2551_s20, %s29_s25  }
   0xc   : > { %p2671_p5 = por %p37_p2, %p36_p0  ;;  %p2677_p6 = por %p3159_p4, %p42_p3 }
   0xd   : > { %p155_p7 = scmp.eq.s32.totalorder %s2653_s22, 1  ;;  %p161_p8 = scmp.eq.s32.totalorder %s1888_s23, 1 }
   0xe   : > { %s3169_s29 = scalar_select %p2677_p6, 1, 0 }
   0xf   : > { %p1889_p9 = scmp.ge.s32.totalorder %s2555_s21, 1  ;;  %p168_p10 = scmp.lt.s32.totalorder %s2555_s21, 3 }
  0x10   : > { %p2684_p11 = por %p155_p7, %p36_p0  ;;  %p2688_p12 = por %p161_p8, %p42_p3 }
  0x11   : > { %p2692_p13 = pnand %p1889_p9, %p168_p10  ;;  %s2593_s8 = smov [#allocation6]  }
  0x12   : > { %s3170_s30 = scalar_select %p2684_p11, 1, 0 }
  0x13   : > { %s3171_s6 = scalar_select %p2688_p12, 1, 0 }
  0x14   : > { %p2277_p1 = pneg %p2692_p13  ;;  %s180_s9 = sshll.u32 %s2593_s8, 4  ;;  %s181_s9 = int_to_ptr.vmem [resolvable:$true] %s180_s9 }
  0x15   : > { %s2410_s10 = scalar_lea.vmem %s181_s9, 2304  ;;  %p2418_p8 = scmp.lt.s32.totalorder %s181_s9, %s181_s9 }
  0x16   : > { %p2278_p2 = pnand %p2277_p1, %p3159_p4  ;;  %p2411_p7 = scmp.ne.s32.totalorder %s181_s9, %s2410_s10 }
  0x17   : > { %p2419_p6 = scmp.lt.s32.totalorder %s2410_s10, %s2410_s10 }
  0x18   : > { %p2401_p0 = pneg %p2278_p2 }
  0x19   : > { %p2420_p12 = por %p2419_p6, %p2418_p8 }
  0x1a   : > { %p2413_p11 = pnand %p2411_p7, %p2401_p0 }
  0x1c   : > { %p2414_p3 = pneg %p2413_p11 }
  0x1e   : > { %p2421_p9 = pnand %p2420_p12, %p2414_p3 }
  0x20   : > { %2424 = shalt.err (!%p2421_p9)
}
  0x21   : > { %s2594_s11 = smov 128   ;;  %s2595_s12 = smov 8  }
  0x22   : > { %2280 = dma.hbm_to_vmem [thread:$0]  (!%p2278_p2), %s3152_s2, 2304, %s181_s9, [#allocation7], %s2594_s11, %s2594_s11, %s2595_s12  }
  0x23   : > { %p3158_p10 = scmp.ge.s32.totalorder %s2555_s21, 2 }
  0x24   : > { %s2707_s15 = sand.u32 (!%p3158_p10), 1, %s2551_s20   ;;  %s1989_s16 = sshll.u32 (!%p3158_p10), %s2555_s21, 10 }
  0x25   : > { %196 = sbr.rel (%p3158_p10) target bundleno = 68 (0x44), region = 28  ;;  %s1892_s17 = sshll.u32 (!%p3158_p10), %s2707_s15, 6 }
  0x26   : > { %s2714_s26 = scalar_lea.hbm (!%p3158_p10), %s3150_s0, %s1989_s16  ;;  %s204_s8 = scalar_lea.vmem (!%p3158_p10), [#allocation2], %s1892_s17 }
  0x27   : > { %s211_s9 = sshll.u32 (!%p3158_p10), %s204_s8, 4  ;;  %s201_s10 = scalar_lea.sflag (!%p3158_p10), [#allocation3], %s2707_s15  ;;  %s2716_s9 = int_to_ptr.vmem [resolvable:$true] %s211_s9 }
  0x28   : > { %s2425_s11 = scalar_lea.hbm (!%p3158_p10), %s2714_s26, 1024  ;;  %s2429_s14 = scalar_lea.hbm (!%p3158_p10), %s3150_s0, 2048 }
  0x29   : > { %p2426_p6 = scmp.ne.s32.totalorder (!%p3158_p10), %s2714_s26, %s2425_s11  ;;  %p2430_p1 = scmp.lt.s32.totalorder (!%p3158_p10), %s2714_s26, %s3150_s0 }
  0x2a   : > { %p2431_p2 = scmp.lt.s32.totalorder %s2429_s14, %s2425_s11 }
  0x2b   : > { %p2427_p11 = pnand %p2426_p6, %p2671_p5 }
  0x2c   : > { %p2432_p0 = por %p2431_p2, %p2430_p1 }
  0x2d   : > { %p2428_p12 = pneg %p2427_p11 }
  0x2f   : > { %p2433_p7 = pnand %p2432_p0, %p2428_p12 }
  0x31   : > { %2436 = shalt.err (!%p2433_p7)
}
  0x32   : > { %s2437_s17 = scalar_lea.vmem %s2716_s9, 1024  ;;  %s2596_s25 = smov [#allocation2]  }
  0x33   : > { %p2438_p3 = scmp.ne.s32.totalorder %s2716_s9, %s2437_s17  ;;  %s2441_s8 = sshll.u32 %s2596_s25, 4  ;;  %s2442_s8 = int_to_ptr.vmem [resolvable:$false] %s2441_s8 }
  0x34   : > { %s2443_s12 = scalar_lea.vmem %s2442_s8, 2048  ;;  %p2444_p6 = scmp.lt.s32.totalorder %s2716_s9, %s2442_s8 }
  0x35   : > { %p2439_p8 = pnand %p2438_p3, %p2671_p5  ;;  %p2445_p11 = scmp.lt.s32.totalorder %s2443_s12, %s2437_s17 }
  0x37   : > { %p2440_p9 = pneg %p2439_p8  ;;  %p2446_p10 = por %p2445_p11, %p2444_p6 }
  0x39   : > { %p2447_p4 = pnand %p2446_p10, %p2440_p9 }
  0x3b   : > { %2450 = shalt.err (!%p2447_p4)
}
  0x3c   : > { %s2597_s11 = smov 128   ;;  %s2598_s13 = smov 8  }
  0x3d   : > { %2271 = dma.hbm_to_vmem [thread:$0]  (%p2671_p5), %s2714_s26, 1024, %s2716_s9, %s201_s10, %s2597_s11, %s2597_s11, %s2598_s13  }
  0x3e   : > { %220 = sbr.rel (!%p2671_p5) target bundleno = 68 (0x44), region = 36  ;;  %s1895_s14 = sshll.u32 (%p2671_p5), %s2707_s15, 5 }
  0x3f   : > { %s1896_s23 = sshll.u32 (%p2671_p5), %s2555_s21, 3  ;;  %s224_s8 = scalar_lea.vmem (%p2671_p5), [#allocation5], %s1895_s14 }
  0x40   : > { %s226_s25 = scalar_lea.vmem (%p2671_p5), %s3151_s1, %s1896_s23 }
  0x41   : > { %v261_v0 = vld [vmem:[%s226_s25] sm:$0xff] (%p2671_p5)  ;;  %v263_v1 = vld [vmem:[%s226_s25 + $0x10] sm:$0xff] (%p2671_p5) }
  0x42   : > { %v265_v2 = vld [vmem:[%s226_s25 + $0x20] sm:$0xff] (%p2671_p5)  ;;  %262 = vst [vmem:[%s224_s8] sm:$0xff] (%p2671_p5), %v261_v0  ;;  %264 = vst [vmem:[%s224_s8 + $0x8] sm:$0xff] (%p2671_p5), %v263_v1  ;;  %v267_v3 = vld [vmem:[%s226_s25 + $0x30] sm:$0xff] (%p2671_p5) }
  0x43   : > { %266 = vst [vmem:[%s224_s8 + $0x10] sm:$0xff] %v265_v2  ;;  %268 = vst [vmem:[%s224_s8 + $0x18] sm:$0xff] %v267_v3 }
  0x44 PF: > { %277 = sbr.rel (%p2692_p13) target bundleno = 577 (0x241), region = 74  ;;  %s2751_s28 = sand.u32 (!%p2692_p13), 1, %s2547_s19  }
  0x45   : > { %s1898_s15 = sshll.u32 (!%p2692_p13), %s2751_s28, 6  ;;  %s280_s26 = scalar_lea.sflag (!%p2692_p13), [#allocation3], %s2751_s28 }
  0x46   : > { %s283_s9 = scalar_lea.vmem (!%p2692_p13), [#allocation2], %s1898_s15  ;;  %p3173_p4 = scmp.ne.s32.totalorder (!%p2692_p13), %s3169_s29, 0 }
  0x49   : > { %2530 = dma.done.wait (%p3173_p4), %s280_s26, 1024  }
  0x4a   : > { %2532 = vsyncadd (%p3173_p4), %s280_s26, 4294966272  ;;  %s1899_s10 = sshll.u32 %s2751_s28, 5  ;;  %p3174_p5 = scmp.eq.s32.totalorder %s2653_s22, 0 }
  0x4b   : > { %s2760_s12 = scalar_lea.vmem [#allocation5], %s1899_s10 }
  0x4c   : > { %2534 = dma.done.wait (%p3174_p5), [#allocation7], 2304   ;;  %p3175_p13 = pmov %p3174_p5 }
  0x4d   : > { %v325_v4 = vld [vmem:[%s283_s9] sm:$0xff]   ;;  %v326_v5 = vld [vmem:[%s283_s9 + $0x8] sm:$0xff]   ;;  %v327_v6 = vld [vmem:[%s283_s9 + $0x10] sm:$0xff]   ;;  %s2766_s29 = scalar_lea.vmem [#allocation8], %s1898_s15  ;;  %s2784_s7 = smov 0  }
  0x4e   : > { %2536 = vsyncadd (%p3175_p13), [#allocation7], 4294964992  ;;  %v328_v7 = vld [vmem:[%s283_s9 + $0x18] sm:$0xff]   ;;  %v329_v8 = vld [vmem:[%s283_s9 + $0x20] sm:$0xff]  }
  0x4f   : > { %v330_v9 = vld [vmem:[%s283_s9 + $0x28] sm:$0xff]   ;;  %v331_v10 = vld [vmem:[%s283_s9 + $0x30] sm:$0xff]   ;;  %v332_v11 = vld [vmem:[%s283_s9 + $0x38] sm:$0xff]  }
  0x50 LB: >> { %3176 = vst [vmem:[#allocation12_spill] sm:$0xff] %v2559_v11  ;;  %3177 = vst [vmem:[#allocation13_spill] sm:$0xff] %v2563_v10  ;;  %v409_v12 = vld [vmem:[#allocation6 + $0x18] sm:$0xff]  ;;  %v406_v13 = vld [vmem:[#allocation6 + $0x8] sm:$0xff]  ;;  %vm387_vm0 = vcmask 1040384   ;;  %vm410_vm1 = vcmask 130048   ;;  %s2591_s7 = sphi %s2784_s7, %s338_s7   ;;  %v2587_v4 = vphi %v325_v4, %v3203_v4   ;;  %v2583_v5 = vphi %v326_v5, %v3202_v5   ;;  %v2579_v6 = vphi %v327_v6, %v3201_v6   ;;  %v2575_v7 = vphi %v328_v7, %v3200_v7   ;;  %v2571_v8 = vphi %v329_v8, %v3199_v8   ;;  %v2567_v9 = vphi %v330_v9, %v3198_v9   ;;  %v2563_v10 = vphi %v331_v10, %v3197_v10   ;;  %v2559_v11 = vphi %v332_v11, %v3196_v11  }
  0x51   : >> { %3178 = vst [vmem:[#allocation14_spill] sm:$0xff] %v2567_v9  ;;  %3179 = vst [vmem:[#allocation15_spill] sm:$0xff] %v2571_v8  ;;  %v408_v14 = vld [vmem:[#allocation6 + $0x10] sm:$0xff]  ;;  %2097 = vmatprep.subr.mxu0 %v409_v12  ;;  %2113 = vmatprep.subr.mxu1 %v406_v13  ;;  %v405_v15 = vld [vmem:[#allocation6] sm:$0xff]  ;;  %v356_v16 = vrot.slane %v2587_v4, 1  ;;  %v372_v17 = vrot.slane %v2587_v4, 7 }
  0x52   : >> { %3180 = vst [vmem:[#allocation16_spill] sm:$0xff] %v2575_v7  ;;  %3181 = vst [vmem:[#allocation17_spill] sm:$0xff] %v2579_v6  ;;  %2098 = vmatpush3.msra.mxu0 %v409_v12  ;;  %2114 = vmatpush3.msra.mxu1 %v406_v13  ;;  %v355_v18 = vrot.slane %v2583_v5, 1  ;;  %v371_v19 = vrot.slane %v2583_v5, 7  ;;  %v647_v20 = vld [vmem:[#allocation6 + $0x28] sm:$0xff]  ;;  %v357_v23 = vrot.slane %v2579_v6, 1 }
  0x53   : >> { %3182 = vst [vmem:[#allocation18_spill] sm:$0xff] %v2583_v5  ;;  %3183 = vst [vmem:[#allocation19_spill] sm:$0xff] %v2587_v4  ;;  %2099 = vmatprep.subr.mxu0 %v408_v14  ;;  %2115 = vmatprep.subr.mxu1 %v405_v15  ;;  %v389_v21 = vsel %vm387_vm0, %v356_v16, %v372_v17  ;;  %v373_v24 = vrot.slane %v2579_v6, 7  ;;  %v358_v25 = vrot.slane %v2575_v7, 1  ;;  %v374_v26 = vrot.slane %v2575_v7, 7  ;;  %v646_v30 = vld [vmem:[#allocation6 + $0x20] sm:$0xff] }
  0x54   : >> { %2100 = vmatpush3.msra.mxu0 %v408_v14  ;;  %2116 = vmatpush3.msra.mxu1 %v405_v15  ;;  %v388_v22 = vsel %vm387_vm0, %v355_v18, %v371_v19  ;;  %v359_v28 = vrot.slane %v2571_v8, 1  ;;  %v375_v29 = vrot.slane %v2571_v8, 7  ;;  %v360_v31 = vrot.slane %v2567_v9, 1  ;;  %v763_v32 = vld [vmem:[#allocation6 + $0x38] sm:$0xff]  ;;  %v893_v38 = vld [vmem:[#allocation6 + $0x48] sm:$0xff]  ;;  %v762_v39 = vld [vmem:[#allocation6 + $0x30] sm:$0xff] }
  0x55   : >> { %2101 = vmatprep.mubr.msk.f32.mxu0 %vm410_vm1, %v389_v21  ;;  %2117 = vmatprep.mubr.msk.f32.mxu1 %vm410_vm1, %v388_v22  ;;  %v390_v27 = vsel %vm387_vm0, %v357_v23, %v373_v24  ;;  %v391_v33 = vsel %vm387_vm0, %v358_v25, %v374_v26  ;;  %v376_v34 = vrot.slane %v2567_v9, 7  ;;  %v361_v36 = vrot.slane %v2563_v10, 1  ;;  %v1011_v44 = vld [vmem:[#allocation6 + $0x58] sm:$0xff]  ;;  %v892_v46 = vld [vmem:[#allocation6 + $0x40] sm:$0xff]  ;;  %v1010_v47 = vld [vmem:[#allocation6 + $0x50] sm:$0xff]  ;;  %s1983_s16 = sshll.u32 %s2591_s7, 3 }
  0x56   : >> { %2129 = vmatprep.subr.mxu0 %v647_v20  ;;  %2102 = vmatmul.mubr.msk.f32.vlgmr.msra.gmra.mxu0 %vm410_vm1, %v388_v22  ;;  %v392_v35 = vsel %vm387_vm0, %v359_v28, %v375_v29  ;;  %v377_v37 = vrot.slane %v2563_v10, 7  ;;  %v362_v41 = vrot.slane %v2559_v11, 1  ;;  %v378_v42 = vrot.slane %v2559_v11, 7  ;;  %v1127_v48 = vld [vmem:[#allocation6 + $0x68] sm:$0xff]  ;;  %v1264_v49 = vld [vmem:[#allocation6 + $0x78] sm:$0xff]  ;;  %v1126_v50 = vld [vmem:[#allocation6 + $0x60] sm:$0xff]  ;;  %s1659_s17 = scalar_lea.vmem %s2760_s12, %s1983_s16 [#allocation5] }
  0x57   : >> { %2118 = vmatmul.mubr.msk.f32.vlgmr.msra.gmra.mxu1 %vm410_vm1, %v389_v21  ;;  %2130 = vmatpush3.msra.mxu0 %v647_v20  ;;  %v393_v40 = vsel %vm387_vm0, %v360_v31, %v376_v34  ;;  %v1263_v51 = vld [vmem:[#allocation6 + $0x70] sm:$0xff]  ;;  %v1383_v52 = vld [vmem:[#allocation6 + $0x88] sm:$0xff]  ;;  %vm396_vm2 = vcmask 1046528   ;;  %v1382_v56 = vld [vmem:[#allocation6 + $0x80] sm:$0xff]  ;;  %v1661_v14 = vlaneseq  ;;  %vm1528_vm3 = vcmask 523264   ;;  %s338_s7 = sadd.s32 1, %s2591_s7  }
  0x58   : >> { %2104 = vmatprep.mubr.msk.f32.mxu0 %vm410_vm1, %v390_v27  ;;  %2120 = vmatprep.mubr.msk.f32.mxu1 %vm410_vm1, %v388_v22  ;;  %v394_v43 = vsel %vm387_vm0, %v361_v36, %v377_v37  ;;  %v395_v45 = vsel %vm387_vm0, %v362_v41, %v378_v42  ;;  %v397_v53 = vsel %vm396_vm2, %v355_v18, %v371_v19  ;;  %v1527_v62 = vld [vmem:[%s3154_s4 + $0x38] sm:$0xff]  ;;  %v1526_v63 = vld [vmem:[%s3154_s4 + $0x30] sm:$0xff]  ;;  %v1525_v0 = vld [vmem:[%s3154_s4 + $0x28] sm:$0xff]  ;;  %p335_p10 = scmp.ge.s32.totalorder %s338_s7, 4  }
  0x59   : >> { %2131 = vmatprep.subr.mxu0 %v646_v30  ;;  %2145 = vmatprep.subr.mxu1 %v763_v32  ;;  %v398_v54 = vsel %vm396_vm2, %v356_v16, %v372_v17  ;;  %v399_v55 = vsel %vm396_vm2, %v357_v23, %v373_v24  ;;  %v400_v57 = vsel %vm396_vm2, %v358_v25, %v374_v26  ;;  %v1524_v1 = vld [vmem:[%s3154_s4 + $0x20] sm:$0xff]  ;;  %v1523_v2 = vld [vmem:[%s3154_s4 + $0x18] sm:$0xff]  ;;  %v1522_v3 = vld [vmem:[%s3154_s4 + $0x10] sm:$0xff]  ;;  %v1662_v15 = vshrl.u32 %v1661_v14, 7  ;;  %s1990_s12 = sshll.u32 (%p335_p10), %s2653_s22, 10  ;;  %s1756_s9 = sshll.u32 (%p335_p10), %s2766_s29, 4  ;;  %s3107_s9 = int_to_ptr.vmem [resolvable:$true] %s1756_s9 }
  0x5a   : >> { %2105 = vmatmul.mubr.msk.f32.gmra.mxu0 %vm410_vm1, %v391_v33  ;;  %2146 = vmatpush3.msra.mxu1 %v763_v32  ;;  %v401_v58 = vsel %vm396_vm2, %v359_v28, %v375_v29  ;;  %v402_v59 = vsel %vm396_vm2, %v360_v31, %v376_v34  ;;  %v403_v60 = vsel %vm396_vm2, %v361_v36, %v377_v37  ;;  %v1521_v12 = vld [vmem:[%s3154_s4 + $0x8] sm:$0xff]  ;;  %v1520_v13 = vld [vmem:[%s3154_s4] sm:$0xff]  ;;  %s3104_s26 = scalar_lea.hbm (%p335_p10), %s3155_s5, %s1990_s12  ;;  %s1743_s10 = scalar_lea.sflag (%p335_p10), [#allocation4], %s2751_s28 }
  0x5b   : >> { %2121 = vmatmul.mubr.msk.f32.gmra.mxu1 %vm410_vm1, %v390_v27  ;;  %2107 = vmatprep.mubr.msk.f32.mxu0 %vm410_vm1, %v392_v35  ;;  %v404_v61 = vsel %vm396_vm2, %v362_v41, %v378_v42  ;;  %v1660_v16 = vld [vmem:[%s1659_s17] sm:$0xff]  ;;  %v1663_v17 = vsub.s32 0, %v1662_v15  ;;  %v1677_v18 = vsub.s32 2, %v1662_v15  ;;  %v1670_v19 = vsub.s32 1, %v1662_v15  ;;  %s2451_s11 = scalar_lea.vmem (%p335_p10), %s3107_s9, 1024  ;;  %p3204_p1 = scmp.ne.s32.totalorder (%p335_p10), %s3170_s30, 0 }
  0x5c   : >> { %2123 = vmatprep.mubr.msk.f32.mxu1 %vm410_vm1, %v391_v33  ;;  %2132 = vmatpush3.msra.mxu0 %v646_v30  ;;  %v1684_v20 = vsub.s32 3, %v1662_v15  ;;  %v1698_v25 = vsub.s32 5, %v1662_v15  ;;  %v1691_v26 = vsub.s32 4, %v1662_v15  ;;  %v1712_v29 = vsub.s32 7, %v1662_v15  ;;  %p2452_p12 = scmp.ne.s32.totalorder (%p335_p10), %s3107_s9, %s2451_s11  ;;  %s2599_s13 = smov (%p335_p10), [#allocation8]  }
  0x5d   : >> { %2161 = vmatprep.subr.mxu0 %v893_v38  ;;  %2147 = vmatprep.subr.mxu1 %v762_v39  ;;  %v1664_v21 = vrot.slane %v1660_v16, %v1663_v17  ;;  %v1671_v23 = vrot.slane %v1660_v16, %v1670_v19  ;;  %v1705_v30 = vsub.s32 6, %v1662_v15  ;;  %s2455_s14 = sshll.u32 (%p335_p10), %s2599_s13, 4  ;;  %s2456_s14 = int_to_ptr.vmem [resolvable:$false] %s2455_s14 }
  0x5e   : >> { %2108 = vmatmul.mubr.msk.f32.gmra.mxu0 %vm410_vm1, %v393_v40  ;;  %2148 = vmatpush3.msra.mxu1 %v762_v39  ;;  %v1685_v24 = vrot.slane %v1660_v16, %v1684_v20  ;;  %v1692_v28 = vrot.slane %v1660_v16, %v1691_v26  ;;  %v1713_v31 = vrot.slane %v1660_v16, %v1712_v29  ;;  %p2453_p2 = pnand (%p335_p10), %p2452_p12, %p3204_p1  ;;  %s2457_s22 = scalar_lea.vmem (%p335_p10), %s2456_s14, 2048 }
  0x5f   : >> { %2124 = vmatmul.mubr.msk.f32.gmra.mxu1 %vm410_vm1, %v392_v35  ;;  %2110 = vmatprep.mubr.msk.f32.mxu0 %vm410_vm1, %v394_v43  ;;  %v1706_v32 = vrot.slane %v1660_v16, %v1705_v30  ;;  %p2458_p7 = scmp.lt.s32.totalorder (%p335_p10), %s3107_s9, %s2456_s14  ;;  %p2459_p3 = scmp.lt.s32.totalorder (%p335_p10), %s2457_s22, %s2451_s11 }
  0x60   : >> { %2126 = vmatprep.mubr.msk.f32.mxu1 %vm410_vm1, %v393_v40  ;;  %2177 = vmatprep.subr.mxu1 %v1011_v44  ;;  %p2454_p0 = pneg (%p335_p10), %p2453_p2 }
  0x61   : >> { %1666 = vbcast.lane.b32.xlu0 %v1664_v21, 256  ;;  %p2460_p8 = por (%p335_p10), %p2459_p3, %p2458_p7 }
  0x62   : >> { %2111 = vmatmul.mubr.msk.f32.gmra.mxu0 %vm410_vm1, %v395_v45 }
  0x63   : >> { %2127 = vmatmul.mubr.msk.f32.gmra.mxu1 %vm410_vm1, %v394_v43  ;;  %2133 = vmatprep.mubr.msk.f32.mxu0 %vm410_vm1, %v388_v22  ;;  %v1678_v22 = vrot.slane %v1660_v16, %v1677_v18  ;;  %p2461_p9 = pnand (%p335_p10), %p2460_p8, %p2454_p0 }
  0x64   : >> { %2149 = vmatprep.mubr.msk.f32.mxu1 %vm410_vm1, %v2583_v5 }
  0x65   : >> { %1680 = vbcast.lane.b32.xlu1 %v1678_v22, 256  ;;  %1673 = vbcast.lane.b32.xlu0 %v1671_v23, 256 }
  0x66   : >> { %2134 = vmatmul.mubr.msk.f32.vlgmr.msra.gmra.mxu0 %vm410_vm1, %v390_v27  ;;  %v1699_v27 = vrot.slane %v1660_v16, %v1698_v25 }
  0x67   : >> { %2162 = vmatpush3.msra.mxu0 %v893_v38  ;;  %2150 = vmatmul.mubr.msk.f32.vlgmr.msra.gmra.mxu1 %vm410_vm1, %v2587_v4 }
  0x68   : >> { %2136 = vmatprep.mubr.msk.f32.mxu0 %vm410_vm1, %v391_v33  ;;  %2152 = vmatprep.mubr.msk.f32.mxu1 %vm410_vm1, %v2583_v5 }
  0x69   : >> { %2163 = vmatprep.subr.mxu0 %v892_v46  ;;  %2178 = vmatpush3.msra.mxu1 %v1011_v44 }
  0x6a   : >> { %2137 = vmatmul.mubr.msk.f32.gmra.mxu0 %vm410_vm1, %v392_v35  ;;  %2179 = vmatprep.subr.mxu1 %v1010_v47 }
  0x6b   : >> { %2153 = vmatmul.mubr.msk.f32.gmra.mxu1 %vm410_vm1, %v2579_v6  ;;  %2139 = vmatprep.mubr.msk.f32.mxu0 %vm410_vm1, %v393_v40 }
  0x6c   : >> { %2164 = vmatpush3.msra.mxu0 %v892_v46  ;;  %2155 = vmatprep.mubr.msk.f32.mxu1 %vm410_vm1, %v2575_v7 }
  0x6d   : >> { %2193 = vmatprep.subr.mxu0 %v1127_v48  ;;  %2180 = vmatpush3.msra.mxu1 %v1010_v47 }
  0x6e   : >> { %2140 = vmatmul.mubr.msk.f32.gmra.mxu0 %vm410_vm1, %v394_v43  ;;  %2209 = vmatprep.subr.mxu1 %v1264_v49 }
  0x6f   : >> { %2156 = vmatmul.mubr.msk.f32.gmra.mxu1 %vm410_vm1, %v2571_v8  ;;  %2142 = vmatprep.mubr.msk.f32.mxu0 %vm410_vm1, %v395_v45 }
  0x70   : >> { %2158 = vmatprep.mubr.msk.f32.mxu1 %vm410_vm1, %v2567_v9  ;;  %1687 = vbcast.lane.b32.xlu1 %v1685_v24, 256 }
  0x71   : >> { %1694 = vbcast.lane.b32.xlu0 %v1692_v28, 256 }
  0x72   : >> { %2143 = vmatmul.mubr.msk.f32.gmra.mxu0 %vm410_vm1, %v394_v43 }
  0x73   : >> { %2159 = vmatmul.mubr.msk.f32.gmra.mxu1 %vm410_vm1, %v2563_v10  ;;  %2165 = vmatprep.mubr.msk.f32.mxu0 %vm410_vm1, %v2587_v4 }
  0x74   : >> { %2181 = vmatprep.mubr.msk.f32.mxu1 %vm410_vm1, %v2583_v5  ;;  %1701 = vbcast.lane.b32.xlu1 %v1699_v27, 256 }
  0x75   : >> { %1708 = vbcast.lane.b32.xlu0 %v1706_v32, 256 }
  0x76   : >> { %2166 = vmatmul.mubr.msk.f32.vlgmr.msra.gmra.mxu0 %vm410_vm1, %v2583_v5 }
  0x77   : >> { %2194 = vmatpush3.msra.mxu0 %v1127_v48  ;;  %2182 = vmatmul.mubr.msk.f32.vlgmr.msra.gmra.mxu1 %vm410_vm1, %v2579_v6 }
  0x78   : >> { %2168 = vmatprep.mubr.msk.f32.mxu0 %vm410_vm1, %v2579_v6  ;;  %2184 = vmatprep.mubr.msk.f32.mxu1 %vm410_vm1, %v2575_v7 }
  0x79   : >> { %2195 = vmatprep.subr.mxu0 %v1126_v50  ;;  %2210 = vmatpush3.msra.mxu1 %v1264_v49 }
  0x7a   : >> { %2169 = vmatmul.mubr.msk.f32.gmra.mxu0 %vm410_vm1, %v2575_v7  ;;  %2211 = vmatprep.subr.mxu1 %v1263_v51 }
  0x7b   : >> { %2185 = vmatmul.mubr.msk.f32.gmra.mxu1 %vm410_vm1, %v2571_v8  ;;  %2171 = vmatprep.mubr.msk.f32.mxu0 %vm410_vm1, %v2571_v8 }
  0x7c   : >> { %2196 = vmatpush3.msra.mxu0 %v1126_v50  ;;  %2187 = vmatprep.mubr.msk.f32.mxu1 %vm410_vm1, %v2567_v9 }
  0x7d   : >> { %2225 = vmatprep.subr.mxu0 %v1383_v52  ;;  %2212 = vmatpush3.msra.mxu1 %v1263_v51 }
  0x7e   : >> { %2172 = vmatmul.mubr.msk.f32.gmra.mxu0 %vm410_vm1, %v2567_v9  ;;  %2241 = vmatprep.subr.mxu1 %v1527_v62 }
  0x7f   : >> { %2188 = vmatmul.mubr.msk.f32.gmra.mxu1 %vm410_vm1, %v2563_v10  ;;  %2174 = vmatprep.mubr.msk.f32.mxu0 %vm410_vm1, %v2563_v10 }
  0x80   : >> { %2190 = vmatprep.mubr.msk.f32.mxu1 %vm410_vm1, %v2559_v11  ;;  %1715 = vbcast.lane.b32.xlu1 %v1713_v31, 256 }
  0x82   : >> { %2175 = vmatmul.mubr.msk.f32.gmra.mxu0 %vm410_vm1, %v2559_v11 }
  0x83   : >> { %2191 = vmatmul.mubr.msk.f32.gmra.mxu1 %vm410_vm1, %v2563_v10  ;;  %2197 = vmatprep.mubr.msk.f32.mxu0 %vm410_vm1, %v397_v53 }
  0x84   : >> { %2213 = vmatprep.mubr.msk.f32.mxu1 %vm410_vm1, %v398_v54 }
  0x86   : >> { %2198 = vmatmul.mubr.msk.f32.vlgmr.msra.gmra.mxu0 %vm410_vm1, %v398_v54 }
  0x87   : >> { %2226 = vmatpush3.msra.mxu0 %v1383_v52  ;;  %2214 = vmatmul.mubr.msk.f32.vlgmr.msra.gmra.mxu1 %vm410_vm1, %v397_v53 }
  0x88   : >> { %2200 = vmatprep.mubr.msk.f32.mxu0 %vm410_vm1, %v397_v53  ;;  %2216 = vmatprep.mubr.msk.f32.mxu1 %vm410_vm1, %v399_v55 }
  0x89   : >> { %2227 = vmatprep.subr.mxu0 %v1382_v56  ;;  %2242 = vmatpush3.msra.mxu1 %v1527_v62 }
  0x8a   : >> { %2201 = vmatmul.mubr.msk.f32.gmra.mxu0 %vm410_vm1, %v399_v55  ;;  %2243 = vmatprep.subr.mxu1 %v1526_v63 }
  0x8b   : >> { %2217 = vmatmul.mubr.msk.f32.gmra.mxu1 %vm410_vm1, %v400_v57  ;;  %2203 = vmatprep.mubr.msk.f32.mxu0 %vm410_vm1, %v400_v57 }
  0x8c   : >> { %2228 = vmatpush3.msra.mxu0 %v1382_v56  ;;  %2219 = vmatprep.mubr.msk.f32.mxu1 %vm410_vm1, %v401_v58 }
  0x8d   : >> { %2244 = vmatpush3.msra.mxu1 %v1526_v63 }
  0x8e   : >> { %2204 = vmatmul.mubr.msk.f32.gmra.mxu0 %vm410_vm1, %v401_v58  ;;  %2245 = vmatprep.subr.mxu1 %v1525_v0 }
  0x8f   : >> { %2220 = vmatmul.mubr.msk.f32.gmra.mxu1 %vm410_vm1, %v402_v59  ;;  %2206 = vmatprep.mubr.msk.f32.mxu0 %vm410_vm1, %v402_v59 }
  0x90   : >> { %2222 = vmatprep.mubr.msk.f32.mxu1 %vm410_vm1, %v403_v60  ;;  %2246 = vmatpush3.msra.mxu1 %v1525_v0 }
  0x91   : >> { %2247 = vmatprep.subr.mxu1 %v1524_v1 }
  0x92   : >> { %2207 = vmatmul.mubr.msk.f32.gmra.mxu0 %vm410_vm1, %v403_v60  ;;  %2248 = vmatpush3.msra.mxu1 %v1524_v1 }
  0x93   : >> { %2223 = vmatmul.mubr.msk.f32.gmra.mxu1 %vm410_vm1, %v404_v61  ;;  %2229 = vmatprep.mubr.msk.f32.mxu0 %vm410_vm1, %v397_v53 }
  0x94   : >> { %2249 = vmatprep.subr.mxu1 %v1523_v2 }
  0x95   : >> { %2250 = vmatpush3.msra.mxu1 %v1523_v2 }
  0x96   : >> { %2230 = vmatmul.mubr.msk.f32.vlgmr.msra.gmra.mxu0 %vm410_vm1, %v399_v55  ;;  %2251 = vmatprep.subr.mxu1 %v1522_v3 }
  0x97   : >> { %2232 = vmatprep.mubr.msk.f32.mxu0 %vm410_vm1, %v400_v57  ;;  %2252 = vmatpush3.msra.mxu1 %v1522_v3 }
  0x98   : >> { %2253 = vmatprep.subr.mxu1 %v1521_v12 }
  0x99   : >> { %2254 = vmatpush3.msra.mxu1 %v1521_v12 }
  0x9a   : >> { %2233 = vmatmul.mubr.msk.f32.gmra.mxu0 %vm410_vm1, %v401_v58  ;;  %2255 = vmatprep.subr.mxu1 %v1520_v13 }
  0x9b   : >> { %2235 = vmatprep.mubr.msk.f32.mxu0 %vm410_vm1, %v402_v59  ;;  %2256 = vmatpush3.msra.mxu1 %v1520_v13 }
  0x9e   : >> { %2236 = vmatmul.mubr.msk.f32.gmra.mxu0 %vm410_vm1, %v403_v60 }
  0x9f   : >> { %2238 = vmatprep.mubr.msk.f32.mxu0 %vm410_vm1, %v404_v61 }
  0xa2   : >> { %2239 = vmatmul.mubr.msk.f32.gmra.mxu0 %vm410_vm1, %v403_v60 }
 0x116   : >> { %v2103_v33 = vpop.f32.mrf.mxu0 }
 0x117   : >> { %v2119_v34 = vpop.f32.mrf.mxu1 }
 0x118   : >> { %v501_v35 = vpop.f32.mrf.mxu0  ;;  %v612_v22 = vadd.f32 %v2119_v34, %v2103_v33 }
 0x119   : >> { %v606_v36 = vpop.f32.mrf.mxu1 }
 0x11a   : >> { %v2106_v37 = vpop.f32.mrf.mxu0  ;;  %v607_v25 = vadd.f32 %v606_v36, %v501_v35 }
 0x11b   : >> { %v2122_v38 = vpop.f32.mrf.mxu1 }
 0x11c   : >> { %v511_v39 = vpop.f32.mrf.mxu0  ;;  %v622_v29 = vadd.f32 %v2122_v38, %v2106_v37 }
 0x11d   : >> { %v616_v40 = vpop.f32.mrf.mxu1 }
 0x11e   : >> { %v2109_v41 = vpop.f32.mrf.mxu0  ;;  %v617_v10 = vadd.f32 %v616_v40, %v511_v39 }
 0x11f   : >> { %v2125_v42 = vpop.f32.mrf.mxu1 }
 0x120   : >> { %v521_v43 = vpop.f32.mrf.mxu0  ;;  %v632_v7 = vadd.f32 %v2125_v42, %v2109_v41 }
 0x121   : >> { %v626_v44 = vpop.f32.mrf.mxu1 }
 0x122   : >> { %v2112_v45 = vpop.f32.mrf.mxu0  ;;  %v627_v35 = vadd.f32 %v626_v44, %v521_v43 }
 0x123   : >> { %v2128_v46 = vpop.f32.mrf.mxu1 }
 0x124   : >> { %v3031_v47 = vpop.f32.mrf.mxu0 }
 0x125   : >> { %v636_v48 = vpop.f32.mrf.mxu1 }
 0x126   : >> { %v2135_v49 = vpop.f32.mrf.mxu0  ;;  %v637_v40 = vadd.f32 %v636_v48, %v3031_v47 }
 0x127   : >> { %v2151_v50 = vpop.f32.mrf.mxu1  ;;  %v754_v26 = vadd.f32 %v2135_v49, %v612_v22 }
 0x128   : >> { %v714_v51 = vpop.f32.mrf.mxu0 }
 0x129   : >> { %v844_v52 = vpop.f32.mrf.mxu1  ;;  %v753_v30 = vadd.f32 %v714_v51, %v607_v25  ;;  %v884_v11 = vadd.f32 %v2151_v50, %v754_v26 }
 0x12a   : >> { %v2138_v53 = vpop.f32.mrf.mxu0 }
 0x12b   : >> { %v2154_v54 = vpop.f32.mrf.mxu1  ;;  %v756_v8 = vadd.f32 %v2138_v53, %v622_v29  ;;  %v883_v4 = vadd.f32 %v844_v52, %v753_v30 }
 0x12c   : >> { %v724_v55 = vpop.f32.mrf.mxu0 }
 0x12d   : >> { %v854_v56 = vpop.f32.mrf.mxu1  ;;  %v755_v33 = vadd.f32 %v724_v55, %v617_v10  ;;  %v886_v36 = vadd.f32 %v2154_v54, %v756_v8 }
 0x12e   : >> { %v2141_v57 = vpop.f32.mrf.mxu0 }
 0x12f   : >> { %v2157_v58 = vpop.f32.mrf.mxu1  ;;  %v758_v49 = vadd.f32 %v2141_v57, %v632_v7  ;;  %v885_v38 = vadd.f32 %v854_v56, %v755_v33 }
 0x130   : >> { %v734_v59 = vpop.f32.mrf.mxu0 }
 0x131   : >> { %v864_v60 = vpop.f32.mrf.mxu1  ;;  %v757_v51 = vadd.f32 %v734_v59, %v627_v35  ;;  %v888_v42 = vadd.f32 %v2157_v58, %v758_v49 }
 0x132   : >> { %v2144_v61 = vpop.f32.mrf.mxu0 }
 0x133   : >> { %v2160_v62 = vpop.f32.mrf.mxu1  ;;  %v887_v8 = vadd.f32 %v864_v60, %v757_v51  ;;  %v1974_v60 = vld [vmem:[%s3153_s3] ss:$0 sm:$0xff] }
 0x134   : >> { %v744_v63 = vpop.f32.mrf.mxu0 }
 0x135   : >> { %v3033_v0 = vpop.f32.mrf.mxu1  ;;  %v759_v55 = vadd.f32 %v744_v63, %v637_v40 }
 0x136   : >> { %v2167_v1 = vpop.f32.mrf.mxu0 }
 0x137   : >> { %v2183_v2 = vpop.f32.mrf.mxu1  ;;  %v1002_v34 = vadd.f32 %v2167_v1, %v884_v11  ;;  %v889_v48 = vadd.f32 %v3033_v0, %v759_v55 }
 0x138   : >> { %v962_v3 = vpop.f32.mrf.mxu0 }
 0x139   : >> { %v1078_v12 = vpop.f32.mrf.mxu1  ;;  %v1001_v22 = vadd.f32 %v962_v3, %v883_v4  ;;  %v1118_v25 = vadd.f32 %v2183_v2, %v1002_v34 }
 0x13a   : >> { %v2170_v13 = vpop.f32.mrf.mxu0 }
 0x13b   : >> { %v2186_v14 = vpop.f32.mrf.mxu1  ;;  %v1004_v39 = vadd.f32 %v2170_v13, %v886_v36  ;;  %v1117_v10 = vadd.f32 %v1078_v12, %v1001_v22 }
 0x13c   : >> { %v972_v15 = vpop.f32.mrf.mxu0 }
 0x13d   : >> { %v1088_v16 = vpop.f32.mrf.mxu1  ;;  %v1003_v11 = vadd.f32 %v972_v15, %v885_v38  ;;  %v1120_v7 = vadd.f32 %v2186_v14, %v1004_v39 }
 0x13e   : >> { %v2173_v17 = vpop.f32.mrf.mxu0 }
 0x13f   : >> { %v2189_v18 = vpop.f32.mrf.mxu1  ;;  %v1006_v4 = vadd.f32 %v2173_v17, %v888_v42  ;;  %v1119_v56 = vadd.f32 %v1088_v16, %v1003_v11 }
 0x140   : >> { %v982_v19 = vpop.f32.mrf.mxu0 }
 0x141   : >> { %v3035_v20 = vpop.f32.mrf.mxu1  ;;  %v1005_v57 = vadd.f32 %v982_v19, %v887_v8  ;;  %v1122_v1 = vadd.f32 %v2189_v18, %v1006_v4 }
 0x142   : >> { %v2176_v21 = vpop.f32.mrf.mxu0 }
 0x143   : >> { %v3037_v23 = vpop.f32.mrf.mxu1  ;;  %v1121_v14 = vadd.f32 %v3035_v20, %v1005_v57 }
 0x144   : >> { %3184 = vst [vmem:[#allocation20_spill] sm:$0xff] %v3037_v23  ;;  %v992_v24 = vpop.f32.mrf.mxu0 }
 0x145   : >> { %v3039_v27 = vpop.f32.mrf.mxu1  ;;  %v1007_v12 = vadd.f32 %v992_v24, %v889_v48  ;;  %v3188_v48 = vld [vmem:[#allocation18_spill] sm:$0xff] }
 0x146   : >> { %3185 = vst [vmem:[#allocation21_spill] sm:$0xff] %v3039_v27  ;;  %v2199_v28 = vpop.f32.mrf.mxu0  ;;  %v642_v27 = vadd.f32 %v2128_v46, %v2112_v45 }
 0x147   : >> { %v2215_v31 = vpop.f32.mrf.mxu1  ;;  %v1255_v52 = vadd.f32 %v2199_v28, %v1118_v25 }
 0x148   : >> { %v1215_v32 = vpop.f32.mrf.mxu0  ;;  %v760_v50 = vadd.f32 %v2144_v61, %v642_v27 }
 0x149   : >> { %v1334_v9 = vpop.f32.mrf.mxu1  ;;  %v1254_v44 = vadd.f32 %v1215_v32, %v1117_v10  ;;  %v1374_v59 = vadd.f32 %v2215_v31, %v1255_v52 }
 0x14a   : >> { %v2202_v6 = vpop.f32.mrf.mxu0  ;;  %v890_v45 = vadd.f32 %v2160_v62, %v760_v50 }
 0x14b   : >> { %v2218_v23 = vpop.f32.mrf.mxu1  ;;  %v1257_v47 = vadd.f32 %v2202_v6, %v1120_v7  ;;  %v1373_v2 = vadd.f32 %v1334_v9, %v1254_v44  ;;  %v3186_v17 = vld [vmem:[#allocation20_spill] sm:$0xff] }
 0x14c   : >> { %v1225_v5 = vpop.f32.mrf.mxu0  ;;  %v1008_v61 = vadd.f32 %v2176_v21, %v890_v45  ;;  %v1667_v45 = vpop.permute.xlu0 %1666 }
 0x14d   : >> { %v1344_v53 = vpop.f32.mrf.mxu1  ;;  %v1256_v3 = vadd.f32 %v1225_v5, %v1119_v56  ;;  %v1376_v15 = vadd.f32 %v2218_v23, %v1257_v47  ;;  %v3187_v27 = vld [vmem:[#allocation21_spill] sm:$0xff] }
 0x14e   : >> { %v2205_v37 = vpop.f32.mrf.mxu0  ;;  %v1124_v0 = vadd.f32 %v3186_v17, %v1008_v61  ;;  %v1123_v28 = vadd.f32 %v3187_v27, %v1007_v12 }
 0x14f   : >> { %v2221_v46 = vpop.f32.mrf.mxu1  ;;  %v1259_v16 = vadd.f32 %v2205_v37, %v1122_v1  ;;  %v1375_v18 = vadd.f32 %v1344_v53, %v1256_v3  ;;  %v3189_v3 = vld [vmem:[#allocation19_spill] sm:$0xff] }
 0x150   : >> { %v1235_v41 = vpop.f32.mrf.mxu0 }
 0x151   : >> { %v1354_v62 = vpop.f32.mrf.mxu1  ;;  %v1258_v9 = vadd.f32 %v1235_v41, %v1121_v14  ;;  %v1378_v24 = vadd.f32 %v2221_v46, %v1259_v16  ;;  %v1681_v46 = vpop.permute.xlu1 %1680 }
 0x152   : >> { %v2208_v43 = vpop.f32.mrf.mxu0 }
 0x153   : >> { %v2224_v29 = vpop.f32.mrf.mxu1  ;;  %v1261_v31 = vadd.f32 %v2208_v43, %v1124_v0  ;;  %v1377_v35 = vadd.f32 %v1354_v62, %v1258_v9 }
 0x154   : >> { %v1245_v54 = vpop.f32.mrf.mxu0 }
 0x155   : >> { %v1260_v36 = vadd.f32 %v1245_v54, %v1123_v28  ;;  %v1364_v37 = vpop.f32.mrf.mxu1  ;;  %v1380_v51 = vadd.f32 %v2224_v29, %v1261_v31  ;;  %v1674_v54 = vpop.permute.xlu0 %1673  ;;  %v3193_v28 = vld [vmem:[#allocation15_spill] sm:$0xff]  ;;  %v3194_v31 = vld [vmem:[#allocation12_spill] sm:$0xff] }
 0x156   : >> { %v2231_v58 = vpop.f32.mrf.mxu0  ;;  %v1688_v56 = vpop.permute.xlu1 %1687 }
 0x157   : >> { %v1490_v63 = vadd.f32 %v2231_v58, %v1374_v59  ;;  %v1379_v41 = vadd.f32 %v1364_v37, %v1260_v36 }
 0x158   : >> { %v1450_v13 = vpop.f32.mrf.mxu0 }
 0x159   : >> { %v1489_v6 = vadd.f32 %v1450_v13, %v1373_v2  ;;  %v1505_v19 = vadd.f32 %v1974_v60, %v1490_v63  ;;  %v1695_v62 = vpop.permute.xlu0 %1694  ;;  %v3190_v13 = vld [vmem:[#allocation16_spill] sm:$0xff] }
 0x15a   : >> { %v2234_v21 = vpop.f32.mrf.mxu0  ;;  %v1702_v2 = vpop.permute.xlu1 %1701 }
 0x15b   : >> { %v1504_v5 = vadd.f32 %v1974_v60, %v1489_v6  ;;  %v1492_v26 = vadd.f32 %v2234_v21, %v1376_v15  ;;  %v1513_v23 = vmax.f32 %v1505_v19, 0.0  ;;  %v3191_v6 = vld [vmem:[#allocation17_spill] sm:$0xff] }
 0x15c   : >> { %v1460_v30 = vpop.f32.mrf.mxu0 }
 0x15d   : >> { %v1512_v32 = vmax.f32 %v1504_v5, 0.0  ;;  %v1491_v20 = vadd.f32 %v1460_v30, %v1375_v18  ;;  %v1507_v33 = vadd.f32 %v1974_v60, %v1492_v26  ;;  %v3192_v18 = vld [vmem:[#allocation14_spill] sm:$0xff]  ;;  %v1709_v27 = vpop.permute.xlu0 %1708 }
 0x15e   : >> { %v2237_v34 = vpop.f32.mrf.mxu0  ;;  %v1716_v21 = vpop.permute.xlu1 %1715 }
 0x15f   : >> { %v1506_v49 = vadd.f32 %v1974_v60, %v1491_v20  ;;  %v1494_v22 = vadd.f32 %v2237_v34, %v1378_v24  ;;  %2257 = vmatprep.mubr.msk.f32.mxu1 %vm1528_vm3, %v1512_v32  ;;  %v1515_v40 = vmax.f32 %v1507_v33, 0.0 }
 0x160   : >> { %v1470_v38 = vpop.f32.mrf.mxu0  ;;  %2258 = vmatmul.mubr.msk.f32.vlgmr.msra.gmra.mxu1 %vm1528_vm3, %v1513_v23  ;;  %v3195_v23 = vld [vmem:[#allocation13_spill] sm:$0xff] }
 0x161   : >> { %v1514_v25 = vmax.f32 %v1506_v49, 0.0  ;;  %v1493_v39 = vadd.f32 %v1470_v38, %v1377_v35  ;;  %v1509_v50 = vadd.f32 %v1974_v60, %v1494_v22 }
 0x162   : >> { %v2240_v53 = vpop.f32.mrf.mxu0 }
 0x163   : >> { %v1508_v42 = vadd.f32 %v1974_v60, %v1493_v39  ;;  %v1496_v10 = vadd.f32 %v2240_v53, %v1380_v51  ;;  %2260 = vmatprep.mubr.msk.f32.mxu1 %vm1528_vm3, %v1514_v25  ;;  %v1517_v43 = vmax.f32 %v1509_v50, 0.0 }
 0x164   : >> { %v1480_v11 = vpop.f32.mrf.mxu0  ;;  %2261 = vmatmul.mubr.msk.f32.gmra.mxu1 %vm1528_vm3, %v1515_v40 }
 0x165   : >> { %v1516_v52 = vmax.f32 %v1508_v42, 0.0  ;;  %v1495_v55 = vadd.f32 %v1480_v11, %v1379_v41  ;;  %v1511_v8 = vadd.f32 %v1974_v60, %v1496_v10 }
 0x167   : >> { %v1510_v7 = vadd.f32 %v1974_v60, %v1495_v55  ;;  %2263 = vmatprep.mubr.msk.f32.mxu1 %vm1528_vm3, %v1516_v52  ;;  %v1519_v44 = vmax.f32 %v1511_v8, 0.0 }
 0x168   : >> { %2264 = vmatmul.mubr.msk.f32.gmra.mxu1 %vm1528_vm3, %v1517_v43 }
 0x169   : >> { %v1518_v4 = vmax.f32 %v1510_v7, 0.0 }
 0x16b   : >> { %2266 = vmatprep.mubr.msk.f32.mxu1 %vm1528_vm3, %v1518_v4 }
 0x16c   : >> { %2267 = vmatmul.mubr.msk.f32.gmra.mxu1 %vm1528_vm3, %v1519_v44 }
 0x220   : >> { %v2259_v57 = vpop.f32.mrf.mxu1 }
 0x221   : >> { %v1718_v59 = vmul.f32 %v2259_v57, %v1674_v54 }
 0x222   : >> { %v1619_v47 = vpop.f32.mrf.mxu1 }
 0x223   : >> { %v1726_v61 = vadd.f32 %v3188_v48, %v1718_v59   ;;  %v1717_v58 = vmul.f32 %v1667_v45, %v1619_v47 }
 0x224   : >> { %v2262_v1 = vpop.f32.mrf.mxu1 }
 0x225   : >> { %v1725_v63 = vadd.f32 %v3189_v3, %v1717_v58   ;;  %v1720_v60 = vmul.f32 %v2262_v1, %v1688_v56  ;;  %1735 = vst.msk [vmem:[%s2766_s29 + $0x8] sm:$0xff] (%p335_p10), %vm410_vm1, %v1726_v61 }
 0x226   : >> { %v1629_v12 = vpop.f32.mrf.mxu1 }
 0x227   : >> { %v1728_v14 = vadd.f32 %v3190_v13, %v1720_v60   ;;  %v1719_v15 = vmul.f32 %v1681_v46, %v1629_v12  ;;  %v3203_v4 = vmov %v1725_v63  ;;  %1734 = vst.msk [vmem:[%s2766_s29] sm:$0xff] (%p335_p10), %vm410_vm1, %v1725_v63 }
 0x228   : >> { %v2265_v16 = vpop.f32.mrf.mxu1 }
 0x229   : >> { %v1727_v17 = vadd.f32 %v3191_v6, %v1719_v15   ;;  %v1722_v0 = vmul.f32 %v2265_v16, %v1702_v2  ;;  %v3200_v7 = vmov %v1728_v14  ;;  %1737 = vst.msk [vmem:[%s2766_s29 + $0x18] sm:$0xff] (%p335_p10), %vm410_vm1, %v1728_v14 }
 0x22a   : >> { %v1639_v19 = vpop.f32.mrf.mxu1 }
 0x22b   : >> { %v1730_v26 = vadd.f32 %v3192_v18, %v1722_v0   ;;  %v1721_v9 = vmul.f32 %v1695_v62, %v1639_v19  ;;  %v3201_v6 = vmov %v1727_v17  ;;  %1736 = vst.msk [vmem:[%s2766_s29 + $0x10] sm:$0xff] (%p335_p10), %vm410_vm1, %v1727_v17 }
 0x22c   : >> { %v2268_v5 = vpop.f32.mrf.mxu1 }
 0x22d   : >> { %v1729_v29 = vadd.f32 %v3193_v28, %v1721_v9   ;;  %v1724_v30 = vmul.f32 %v2268_v5, %v1716_v21  ;;  %v3198_v9 = vmov %v1730_v26  ;;  %v3202_v5 = vmov %v1726_v61  ;;  %1739 = vst.msk [vmem:[%s2766_s29 + $0x28] sm:$0xff] (%p335_p10), %vm410_vm1, %v1730_v26 }
 0x22e   : >> { %v1649_v24 = vpop.f32.mrf.mxu1 }
 0x22f   : >> { %v1732_v32 = vadd.f32 %v3194_v31, %v1724_v30   ;;  %v1723_v20 = vmul.f32 %v1709_v27, %v1649_v24  ;;  %v3199_v8 = vmov %v1729_v29  ;;  %337 = sbr.rel (!%p335_p10) target bundleno = 80 (0x50), region = 151  ;;  %1738 = vst.msk [vmem:[%s2766_s29 + $0x20] sm:$0xff] (%p335_p10), %vm410_vm1, %v1729_v29 }
 0x231   : >> { %v1731_v33 = vadd.f32 %v3195_v23, %v1723_v20   ;;  %v3196_v11 = vmov %v1732_v32  ;;  %1741 = vst.msk [vmem:[%s2766_s29 + $0x38] sm:$0xff] (%p335_p10), %vm410_vm1, %v1732_v32 }
 0x233   : >> { %v3197_v10 = vmov %v1731_v33  ;;  %1740 = vst.msk [vmem:[%s2766_s29 + $0x30] sm:$0xff] (%p335_p10), %vm410_vm1, %v1731_v33 }
 0x234   : > { %2464 = shalt.err (!%p2461_p9)
}
 0x235   : > { %s2465_s29 = scalar_lea.hbm %s3104_s26, 1024  ;;  %s2469_s17 = scalar_lea.hbm %s3155_s5, 2048 }
 0x236   : > { %p2466_p6 = scmp.ne.s32.totalorder %s3104_s26, %s2465_s29  ;;  %p2470_p5 = scmp.lt.s32.totalorder %s3104_s26, %s3155_s5 }
 0x237   : > { %p2471_p13 = scmp.lt.s32.totalorder %s2469_s17, %s2465_s29 }
 0x238   : > { %p2467_p11 = pnand %p2466_p6, %p3204_p1 }
 0x239   : > { %p2472_p10 = por %p2471_p13, %p2470_p5 }
 0x23a   : > { %p2468_p4 = pneg %p2467_p11 }
 0x23c   : > { %p2473_p12 = pnand %p2472_p10, %p2468_p4 }
 0x23e   : > { %2476 = shalt.err (!%p2473_p12)
}
 0x23f   : > { %s2600_s12 = smov 128   ;;  %s2601_s7 = smov 8  }
 0x240   : > { %2275 = dma.vmem_to_hbm [thread:$0]  (%p3204_p1), %s3107_s9, 1024, %s3104_s26, %s1743_s10, %s2600_s12, %s2600_s12, %s2601_s7  }
 0x241 PF: > { %s1771_s15 = sand.u32 1, %s2543_s18   ;;  %p3205_p2 = scmp.ne.s32.totalorder %s3171_s6, 0 }
 0x242   : > { %p3206_p0 = scmp.ge.s32.totalorder %s2555_s21, 2  ;;  %s1772_s11 = scalar_lea.sflag [#allocation4], %s1771_s15 }
 0x244   : > { %p2282_p7 = pnand %p3206_p0, %p3205_p2 }
 0x246   : > { %p2283_p3 = pneg %p2282_p7 }
 0x248   : > { %2538 = dma.done.wait (%p2283_p3), %s1772_s11, 1024  }
 0x249   : > { %2540 = vsyncadd (%p2283_p3), %s1772_s11, 4294966272  ;;  %p19_p8 = scmp.ge.s32.totalorder %s2657_s24, 4   ;;  %s3207_s18 = smov %s2547_s19 }
 0x24a   : > { %s3208_s19 = smov %s2551_s20  ;;  %s3209_s20 = smov %s2669_s27 }
 0x24b   : > { %s3210_s21 = smov %s2657_s24  ;;  %21 = sbr.rel (!%p19_p8) target bundleno = 6 (0x6), region = 162 }
 0x250   :  { %1777 = vsyncpa [#allocation3], 1 }
 0x251   :  { %1779 = vsyncpa [#allocation3 + $0x1], 1 }
 0x252   :  { %1780 = vsyncpa [#allocation7], 1 }
 0x253   :  { %1781 = vsyncpa [#allocation4], 1 }
 0x254   :  { %1783 = vsyncpa [#allocation4 + $0x1], 1 }

</bundles_post_ra>
